<compile_context>
chip_gen: v7x
topology: tpu7x:2x2x1
jax: 0.10.0
libtpu: 0.0.40
codegen_flags: <defaults>
</compile_context>

<pallas_src>
import jax
import jax.numpy as jnp
from jax.experimental import pallas as pl
from jax.experimental.pallas import tpu as pltpu


def _round_up(x, m):
    return (x + m - 1) // m * m


def _floor128(x):
    return (x // 128) * 128


def _vmem_capacity_bytes():
    """Physical per-core VMEM (128 MiB on v5e/v6e, 64 MiB on v7x)."""
    try:
        get_info = getattr(pltpu, "get_tpu_info", None)
        if get_info is not None:
            cap = getattr(get_info(), "vmem_capacity_bytes", None)
            if cap:
                return int(cap)
    except Exception:
        pass
    return 64 * 1024 * 1024  # conservative fallback, safe on every chip


# ----------------------------- kernel bodies ---------------------------------
def _fused_kernel(x_ref, w_ref, adj_ref, b_ref, out_ref):
    """Small-problem path: everything resident in VMEM, single block."""
    xw = jnp.dot(x_ref[...], w_ref[...], preferred_element_type=jnp.float32)
    y = jnp.dot(adj_ref[...], xw.astype(adj_ref.dtype),
                preferred_element_type=jnp.float32)
    y = y + b_ref[...]
    out_ref[...] = jnp.where(y > 0, y, 0.2 * y).astype(out_ref.dtype)


def _xw_kernel(x_ref, w_ref, xw_ref):
    """XW = x @ W  (row-tiled, W resident)."""
    xw_ref[...] = jnp.dot(
        x_ref[...], w_ref[...], preferred_element_type=jnp.float32
    ).astype(xw_ref.dtype)


def _agg_resident_kernel(adj_ref, xw_ref, b_ref, out_ref):
    """out = LeakyReLU(adj_stripe @ XW + b) with XW fully resident."""
    y = jnp.dot(adj_ref[...], xw_ref[...], preferred_element_type=jnp.float32)
    y = y + b_ref[...]
    out_ref[...] = jnp.where(y > 0, y, 0.2 * y).astype(out_ref.dtype)


def _agg_ktiled_kernel(adj_ref, xw_ref, b_ref, out_ref, acc_ref):
    """Same product with the K=N contraction tiled; f32 scratch accumulator.
    Per-step VMEM is independent of N (large-N / v7x path)."""
    k = pl.program_id(1)

    @pl.when(k == 0)
    def _():
        acc_ref[...] = jnp.zeros_like(acc_ref)

    acc_ref[...] += jnp.dot(adj_ref[...], xw_ref[...],
                            preferred_element_type=jnp.float32)

    @pl.when(k == pl.num_programs(1) - 1)
    def _():
        y = acc_ref[...] + b_ref[...]
        out_ref[...] = jnp.where(y > 0, y, 0.2 * y).astype(out_ref.dtype)


# ------------------------------- wrapper --------------------------------------
def graph_conv(inputs, adj, w, b, *, matmul_dtype=None, row_tile=None,
               k_tile=None, vmem_budget_bytes=None, path="auto"):
    """GraphConv forward: LeakyReLU_{0.2}(adj @ (inputs @ w) + b).

    inputs: [N, C_in], adj: [N, N], w: [C_in, C_out], b: [C_out].
    matmul_dtype: dtype of the MXU operands (adj/x/W/XW); accumulation and the
      bias+LeakyReLU epilogue stay f32.  Store adj persistently in this dtype
      at the call site to realize the HBM saving.
    row_tile / k_tile: optional caps on the auto-chosen tile sizes (testing).
    path: "auto" | "fused" | "resident" | "ktiled".
    """
    n, c_in = inputs.shape
    c_in_w, c_out = w.shape
    assert c_in_w == c_in and adj.shape == (n, n) and b.shape == (c_out,)

    out_dtype = inputs.dtype
    mm_dtype = (jnp.dtype(matmul_dtype) if matmul_dtype is not None
                else jnp.dtype(adj.dtype))
    mm_isz = mm_dtype.itemsize
    out_isz = jnp.dtype(out_dtype).itemsize

    # Pad lane / contraction dims to multiples of 128 (exact for matmul, bias
    # and LeakyReLU; padded region sliced off at the end).  Small operands are
    # always padded (cheap).
    n_p = _round_up(n, 128)
    c_in_p = _round_up(c_in, 128)
    c_out_p = _round_up(c_out, 128)

    x_p = jnp.zeros((n_p, c_in_p), mm_dtype).at[:n, :c_in].set(
        inputs.astype(mm_dtype))
    w_p = jnp.zeros((c_in_p, c_out_p), mm_dtype).at[:c_in, :c_out].set(
        w.astype(mm_dtype))
    b_p = jnp.zeros((1, c_out_p), jnp.float32).at[0, :c_out].set(
        b.astype(jnp.float32))

    # adj is the dominant HBM traffic: skip the O(N^2) pad/cast copy whenever
    # possible (128-aligned N and matching dtype -> zero-copy pass-through).
    if n_p == n and jnp.dtype(adj.dtype) == mm_dtype:
        adj_p = adj
    else:
        # TODO(synk): for ragged N, a full-extent lane/contraction dim (legal
        # for BlockSpec) would avoid materializing the padded N_p x N_p copy.
        adj_p = jnp.zeros((n_p, n_p), mm_dtype).at[:n, :n].set(
            adj.astype(mm_dtype))

    # ---- per-chip VMEM budget + headroom for Mosaic internal scratch --------
    if vmem_budget_bytes is None:
        vmem_budget_bytes = (3 * _vmem_capacity_bytes()) // 4  # ~96MiB v5e/v6e, ~48MiB v7x
    vmem_budget_bytes = int(vmem_budget_bytes)
    sizing = max(vmem_budget_bytes - 4 * 1024 * 1024, vmem_budget_bytes // 2)

    def _cparams(dims=None):
        return pltpu.CompilerParams(
            # TODO(synk): on v7x, verify in the trace that the row axis really
            # shards across the 2 TensorCores; try pltpu.CORE_PARALLEL if not.
            dimension_semantics=dims,
            vmem_limit_bytes=vmem_budget_bytes)

    # ---- path selection (VMEM-footprint gates) -------------------------------
    fused_bytes = ((n_p * c_in_p + c_in_p * c_out_p + n_p * n_p) * mm_isz
                   + n_p * c_out_p * 4                # in-kernel XW temporary
                   + n_p * c_out_p * out_isz + c_out_p * 4)
    fused_ok = (n_p <= 2048) and (fused_bytes <= sizing // 2)

    # resident-XW streaming: 2x adj stripes + 2x resident XW (default
    # double-buffering charged explicitly) + 2x out tiles + bias.
    fixed_a = 2 * n_p * c_out_p * mm_isz + 2 * c_out_p * 4
    per_row_a = 2 * n_p * mm_isz + 2 * c_out_p * out_isz
    tm_a = min(_floor128(max(sizing - fixed_a, 0) // per_row_a), n_p)

    def _ktile_plan(tk_cap):
        # tk must divide n_p exactly (contraction garbage would corrupt sums).
        for tk in (2048, 1024, 512, 256, 128):
            if tk > n_p or n_p % tk or tk > tk_cap:
                continue
            fixed_b = 2 * tk * c_out_p * mm_isz + 2 * c_out_p * 4
            per_row_b = 2 * tk * mm_isz + 2 * c_out_p * out_isz + c_out_p * 4
            tm = min(_floor128(max(sizing - fixed_b, 0) // per_row_b), n_p)
            if tm >= 128:
                return tm, tk
        return 0, 0

    if path == "auto":
        path = "fused" if fused_ok else ("resident" if tm_a >= 128 else "ktiled")
    if path == "resident" and tm_a < 128:
        path = "ktiled"  # graceful large-N fallback instead of VMEM overflow

    def _cap_rows(tm):
        if row_tile is not None:
            tm = min(tm, max(128, _round_up(int(row_tile), 128)))
        return max(128, min(tm, n_p))

    # ------------------------------ fused path --------------------------------
    if path == "fused":
        out_p = pl.pallas_call(
            _fused_kernel,
            out_shape=jax.ShapeDtypeStruct((n_p, c_out_p), out_dtype),
            compiler_params=_cparams(),
            cost_estimate=pl.CostEstimate(
                flops=2 * n_p * c_in_p * c_out_p + 2 * n_p * n_p * c_out_p,
                transcendentals=0,
                bytes_accessed=int(fused_bytes)),
        )(x_p, w_p, adj_p, b_p)
        return out_p[:n, :c_out]

    # --------------------- kernel 1: XW = x @ W (own, large, tile) ------------
    fixed_1 = 2 * c_in_p * c_out_p * mm_isz
    per_row_1 = 2 * (c_in_p + c_out_p) * mm_isz
    tm1 = min(_floor128(max(sizing - fixed_1, 0) // per_row_1), n_p)
    if tm1 >= 128:
        xw = pl.pallas_call(
            _xw_kernel,
            out_shape=jax.ShapeDtypeStruct((n_p, c_out_p), mm_dtype),
            grid=(pl.cdiv(n_p, tm1),),
            in_specs=[pl.BlockSpec((tm1, c_in_p), lambda i: (i, 0)),
                      pl.BlockSpec((c_in_p, c_out_p), lambda i: (0, 0))],
            out_specs=pl.BlockSpec((tm1, c_out_p), lambda i: (i, 0)),
            compiler_params=_cparams(("parallel",)),
            cost_estimate=pl.CostEstimate(
                flops=2 * n_p * c_in_p * c_out_p,
                transcendentals=0,
                bytes_accessed=(n_p * c_in_p + c_in_p * c_out_p
                                + n_p * c_out_p) * mm_isz),
        )(x_p, w_p)
    else:
        # W too large to keep resident next to any 128-row stripe: per the
        # review, just let XLA compute x @ W (kernel 2 dominates anyway).
        xw = jnp.dot(x_p, w_p,
                     preferred_element_type=jnp.float32).astype(mm_dtype)

    # ------------------- kernel 2, variant A: resident XW ---------------------
    if path == "resident":
        tm = _cap_rows(tm_a)
        out_p = pl.pallas_call(
            _agg_resident_kernel,
            out_shape=jax.ShapeDtypeStruct((n_p, c_out_p), out_dtype),
            grid=(pl.cdiv(n_p, tm),),
            in_specs=[
                pl.BlockSpec((tm, n_p), lambda i: (i, 0)),       # adj stripe (streams)
                pl.BlockSpec((n_p, c_out_p), lambda i: (0, 0)),  # XW resident
                pl.BlockSpec((1, c_out_p), lambda i: (0, 0)),    # bias resident
            ],
            out_specs=pl.BlockSpec((tm, c_out_p), lambda i: (i, 0)),
            compiler_params=_cparams(("parallel",)),
            cost_estimate=pl.CostEstimate(
                flops=2 * n_p * n_p * c_out_p,
                transcendentals=0,
                bytes_accessed=(n_p * n_p + n_p * c_out_p) * mm_isz
                               + n_p * c_out_p * out_isz),
        )(adj_p, xw, b_p)
        return out_p[:n, :c_out]

    # -------------- kernel 2, variant B: K-tiled accumulator ------------------
    tk_cap = max(128, min(n_p, int(k_tile) if k_tile is not None else 2048))
    tm, tk = _ktile_plan(tk_cap)
    if tm == 0:
        # TODO(synk): would additionally need output-column tiling; fall back
        # to plain XLA to stay correct (only reachable at extreme C_out).
        y = jnp.dot(adj_p.astype(jnp.float32), xw.astype(jnp.float32)) + b_p
        return jnp.where(y > 0, y, 0.2 * y).astype(out_dtype)[:n, :c_out]
    tm = _cap_rows(tm)
    n_row_steps = int(pl.cdiv(n_p, tm))
    out_p = pl.pallas_call(
        _agg_ktiled_kernel,
        out_shape=jax.ShapeDtypeStruct((n_p, c_out_p), out_dtype),
        grid=(n_row_steps, n_p // tk),
        in_specs=[
            pl.BlockSpec((tm, tk), lambda i, kk: (i, kk)),        # adj tile
            pl.BlockSpec((tk, c_out_p), lambda i, kk: (kk, 0)),   # XW K-tile
            pl.BlockSpec((1, c_out_p), lambda i, kk: (0, 0)),     # bias
        ],
        out_specs=pl.BlockSpec((tm, c_out_p), lambda i, kk: (i, 0)),
        scratch_shapes=[pltpu.VMEM((tm, c_out_p), jnp.float32)],
        compiler_params=_cparams(("parallel", "arbitrary")),
        cost_estimate=pl.CostEstimate(
            flops=2 * n_p * n_p * c_out_p,
            transcendentals=0,
            bytes_accessed=n_p * n_p * mm_isz
                           + n_row_steps * n_p * c_out_p * mm_isz
                           + n_p * c_out_p * out_isz),
    )(adj_p, xw, b_p)
    return out_p[:n, :c_out]


def reference_graph_conv(inputs, adj, w, b):
    y = adj @ (inputs @ w) + b
    return jnp.where(y > 0, y, 0.2 * y)


if __name__ == "__main__":
    def make_problem(key, n, c_in, c_out):
        kx, ka, kw, kb = jax.random.split(key, 4)
        x = jax.random.normal(kx, (n, c_in), dtype=jnp.float32)
        raw = jax.random.uniform(ka, (n, n), dtype=jnp.float32)
        adj = (raw + raw.T) * 0.5 + jnp.eye(n, dtype=jnp.float32)
        adj = adj / jnp.sum(adj, axis=1, keepdims=True)       # row-normalized
        bound = (6.0 / (c_in + c_out)) ** 0.5                  # xavier_uniform_
        w = jax.random.uniform(kw, (c_in, c_out), dtype=jnp.float32,
                               minval=-bound, maxval=bound)
        b = 0.1 * jax.random.normal(kb, (c_out,), dtype=jnp.float32)
        return x, adj, w, b

    k1, k2 = jax.random.split(jax.random.PRNGKey(0))

    # 1) module-scale tiny graph -> fused single-block path.
    x, adj, w, b = make_problem(k1, 16, 32, 32)
    ref = reference_graph_conv(x, adj, w, b)
    out = jax.block_until_ready(graph_conv(x, adj, w, b))
    assert out.shape == (16, 32)
    assert jnp.allclose(out, ref, atol=1e-4, rtol=1e-4)

    # 2) ragged N (200 -> padded 256): resident-XW streaming path, 2 row steps.
    x, adj, w, b = make_problem(k2, 200, 32, 48)
    ref = reference_graph_conv(x, adj, w, b)
    out = jax.block_until_ready(
        graph_conv(x, adj, w, b, path="resident", row_tile=128))
    assert out.shape == (200, 48)
    assert jnp.allclose(out, ref, atol=1e-4, rtol=1e-4)

    # 3) K-tiled accumulator path (2x2 grid) -- the large-N / v7x fallback.
    out = jax.block_until_ready(
        graph_conv(x, adj, w, b, path="ktiled", row_tile=128, k_tile=128))
    assert out.shape == (200, 48)
    assert jnp.allclose(out, ref, atol=1e-4, rtol=1e-4)

    # 4) bf16 matmul operands (f32 accumulation + f32 epilogue).
    out = jax.block_until_ready(
        graph_conv(x, adj, w, b, matmul_dtype=jnp.bfloat16,
                   path="resident", row_tile=128))
    assert jnp.allclose(out, ref, atol=5e-2, rtol=5e-2)

    print("KERNEL_OK")
</pallas_src>

<mosaic_0001>
module attributes {stable_mosaic.version = 11 : i64} {
  func.func @_fused_kernel(%arg0: memref<128x128xf32, #tpu.memory_space<vmem>>, %arg1: memref<128x128xf32, #tpu.memory_space<vmem>>, %arg2: memref<128x128xf32, #tpu.memory_space<vmem>>, %arg3: memref<1x128xf32, #tpu.memory_space<vmem>>, %arg4: memref<128x128xf32, #tpu.memory_space<vmem>>) attributes {dimension_semantics = [], scalar_prefetch = 0 : i64, scratch_operands = 0 : i64, tpu.core_type = #tpu.core_type<tc>} {
    %c0 = arith.constant 0 : index
    %c0_0 = arith.constant 0 : index
    %0 = vector.load %arg0[%c0, %c0_0] : memref<128x128xf32, #tpu.memory_space<vmem>>, vector<128x128xf32>
    %c0_1 = arith.constant 0 : index
    %c0_2 = arith.constant 0 : index
    %1 = vector.load %arg1[%c0_1, %c0_2] : memref<128x128xf32, #tpu.memory_space<vmem>>, vector<128x128xf32>
    %cst = arith.constant dense<0.000000e+00> : vector<128x128xf32>
    %2 = tpu.matmul %0, %1, %cst {dimension_numbers = #tpu.dot_dimension_numbers<[1], [0], [0], [1], [0, 0, 1, 1], [], []>} : vector<128x128xf32>, vector<128x128xf32>, vector<128x128xf32> -> vector<128x128xf32>
    %c0_3 = arith.constant 0 : index
    %c0_4 = arith.constant 0 : index
    %3 = vector.load %arg2[%c0_3, %c0_4] : memref<128x128xf32, #tpu.memory_space<vmem>>, vector<128x128xf32>
    %cst_5 = arith.constant dense<0.000000e+00> : vector<128x128xf32>
    %4 = tpu.matmul %3, %2, %cst_5 {dimension_numbers = #tpu.dot_dimension_numbers<[1], [0], [0], [1], [0, 0, 1, 1], [], []>} : vector<128x128xf32>, vector<128x128xf32>, vector<128x128xf32> -> vector<128x128xf32>
    %c0_6 = arith.constant 0 : index
    %c0_7 = arith.constant 0 : index
    %5 = vector.load %arg3[%c0_6, %c0_7] : memref<1x128xf32, #tpu.memory_space<vmem>>, vector<1x128xf32>
    %6 = vector.broadcast %5 : vector<1x128xf32> to vector<128x128xf32>
    %7 = arith.addf %4, %6 : vector<128x128xf32>
    %cst_8 = arith.constant 0.000000e+00 : f32
    %8 = vector.broadcast %cst_8 : f32 to vector<128x128xf32>
    %9 = arith.cmpf ogt, %7, %8 : vector<128x128xf32>
    %cst_9 = arith.constant 2.000000e-01 : f32
    %10 = vector.broadcast %cst_9 : f32 to vector<128x128xf32>
    %11 = arith.mulf %10, %7 : vector<128x128xf32>
    %12 = arith.select %9, %7, %11 : vector<128x128xi1>, vector<128x128xf32>
    %c0_10 = arith.constant 0 : index
    %c0_11 = arith.constant 0 : index
    %13 = vector.load %arg4[%c0_10, %c0_11] : memref<128x128xf32, #tpu.memory_space<vmem>>, vector<128x128xf32>
    tpu.vector_store %arg4[%c0_10, %c0_11], %12 {strides = array<i32>} : memref<128x128xf32, #tpu.memory_space<vmem>>, vector<128x128xf32>,
    return
  }
}

</mosaic_0001>

<bundles_post_ra>
// kernel: tpu_custom_call.1
= control target key start
LH: loop header
LB: loop body
LE: loop exit
PB: predicated region body
PF: predicated region fallthrough
CT: control target
= control target key end

     0   :  { %9 = vsyncpa [#allocation3], 0  ;;  %s946_s0 = inlined_call_operand.hbm [shape: f32[128,128], index: 0, kind: input, shape index: {}]   ;;  %s947_s1 = inlined_call_operand.hbm [shape: f32[128,128], index: 1, kind: input, shape index: {}]   ;;  %s948_s2 = inlined_call_operand.hbm [shape: f32[128,128], index: 2, kind: input, shape index: {}]   ;;  %s949_s3 = inlined_call_operand.vmem [shape: f32[1,128], index: 3, kind: input, shape index: {}]   ;;  %s950_s4 = inlined_call_operand.hbm [shape: f32[128,128], index: 4, kind: output, shape index: {}]  }
   0x1   :  { %10 = vsyncpa [#allocation6], 0 }
   0x2   :  { %11 = vsyncpa [#allocation4], 0  ;;  %s827_s15 = smov [#allocation5]   ;;  %s828_s17 = smov [#allocation2]  }
   0x3   :  { %s29_s16 = sshll.u32 %s827_s15, 4  ;;  %s17_s18 = sshll.u32 %s828_s17, 4  ;;  %s30_s16 = int_to_ptr.vmem [resolvable:$true] %s29_s16  ;;  %s858_s18 = int_to_ptr.vmem [resolvable:$true] %s17_s18 }
   0x4   :  { %s733_s21 = scalar_lea.hbm %s947_s1, 2048 }
   0x5   :  { %p734_p0 = scmp.ne.s32.totalorder %s947_s1, %s733_s21  ;;  %p737_p1 = scmp.lt.u32.totalorder %s733_s21, %s947_s1 }
   0x7   :  { %p739_p2 = pnand %p737_p1, %p734_p0 }
   0x9   :  { %742 = shalt.err (!%p739_p2)
}
   0xa   :  { %s743_s26 = scalar_lea.vmem %s30_s16, 2048  ;;  %p748_p4 = scmp.lt.s32.totalorder %s30_s16, %s30_s16 }
   0xb   :  { %p744_p3 = scmp.ne.s32.totalorder %s30_s16, %s743_s26  ;;  %p749_p5 = scmp.lt.s32.totalorder %s743_s26, %s743_s26 }
   0xd   :  { %p750_p6 = por %p749_p5, %p748_p4 }
   0xf   :  { %p751_p7 = pnand %p750_p6, %p744_p3 }
  0x11   :  { %754 = shalt.err (!%p751_p7)
}
  0x12   :  { %s829_s27 = smov 128   ;;  %s830_s28 = smov 8  }
  0x13   :  { %35 = dma.hbm_to_vmem [thread:$0]  %s947_s1, 2048, %s30_s16, [#allocation6], %s829_s27, %s829_s27, %s830_s28  }
  0x14   :  { %s755_s7 = scalar_lea.hbm %s946_s0, 2048 }
  0x15   :  { %p756_p8 = scmp.ne.s32.totalorder %s946_s0, %s755_s7  ;;  %p759_p9 = scmp.lt.u32.totalorder %s755_s7, %s946_s0 }
  0x17   :  { %p761_p10 = pnand %p759_p9, %p756_p8 }
  0x19   :  { %764 = shalt.err (!%p761_p10)
}
  0x1a   :  { %s765_s12 = scalar_lea.vmem %s858_s18, 2048  ;;  %p770_p12 = scmp.lt.s32.totalorder %s858_s18, %s858_s18 }
  0x1b   :  { %p766_p11 = scmp.ne.s32.totalorder %s858_s18, %s765_s12  ;;  %p771_p13 = scmp.lt.s32.totalorder %s765_s12, %s765_s12 }
  0x1d   :  { %p772_p0 = por %p771_p13, %p770_p12 }
  0x1f   :  { %p773_p1 = pnand %p772_p0, %p766_p11 }
  0x21   :  { %776 = shalt.err (!%p773_p1)
}
  0x22   :  { %23 = dma.hbm_to_vmem [thread:$0]  %s946_s0, 2048, %s858_s18, [#allocation3], %s829_s27, %s829_s27, %s830_s28  }
  0x23   :  { %s831_s14 = smov [#allocation7]   ;;  %s777_s19 = scalar_lea.hbm %s948_s2, 2048 }
  0x24   :  { %s41_s15 = sshll.u32 %s831_s14, 4  ;;  %p778_p2 = scmp.ne.s32.totalorder %s948_s2, %s777_s19  ;;  %s42_s15 = int_to_ptr.vmem [resolvable:$true] %s41_s15 }
  0x25   :  { %p781_p3 = scmp.lt.u32.totalorder %s777_s19, %s948_s2 }
  0x27   :  { %p783_p4 = pnand %p781_p3, %p778_p2 }
  0x29   :  { %786 = shalt.err (!%p783_p4)
}
  0x2a   :  { %s787_s24 = scalar_lea.vmem %s42_s15, 2048  ;;  %p792_p6 = scmp.lt.s32.totalorder %s42_s15, %s42_s15 }
  0x2b   :  { %p788_p5 = scmp.ne.s32.totalorder %s42_s15, %s787_s24  ;;  %p793_p7 = scmp.lt.s32.totalorder %s787_s24, %s787_s24 }
  0x2d   :  { %p794_p8 = por %p793_p7, %p792_p6 }
  0x2f   :  { %p795_p9 = pnand %p794_p8, %p788_p5 }
  0x31   :  { %798 = shalt.err (!%p795_p9)
}
  0x32   :  { %47 = dma.hbm_to_vmem [thread:$0]  %s948_s2, 2048, %s42_s15, [#allocation6], %s829_s27, %s829_s27, %s830_s28  }
  0x33   :  { %821 = dma.done.wait [#allocation3], 2048  }
  0x34   :  { %822 = vsyncadd [#allocation3], 4294965248 }
  0x35   :  { %823 = dma.done.wait [#allocation6], 4096  }
  0x36   :  { %824 = vsyncadd [#allocation6], 4294963200  ;;  %v75_v0 = vld [vmem:[#allocation5] sm:$0xff]  ;;  %v76_v1 = vld [vmem:[#allocation5 + $0x8] sm:$0xff] }
  0x37   :  { %v77_v2 = vld [vmem:[#allocation5 + $0x10] sm:$0xff]  ;;  %v663_v3 = vpack.c.bf16 %v76_v1, %v75_v0  ;;  %v78_v4 = vld [vmem:[#allocation5 + $0x18] sm:$0xff]  ;;  %v79_v6 = vld [vmem:[#allocation5 + $0x20] sm:$0xff] }
  0x38   :  { %v667_v5 = vpack.c.bf16 %v78_v4, %v77_v2  ;;  %v80_v7 = vld [vmem:[#allocation5 + $0x28] sm:$0xff]  ;;  %v59_v9 = vld [vmem:[#allocation2] sm:$0xff]  ;;  %v81_v10 = vld [vmem:[#allocation5 + $0x30] sm:$0xff] }
  0x39   :  { %664 = vmatprep.subr.bf16.mxu0 %v663_v3  ;;  %v671_v8 = vpack.c.bf16 %v80_v7, %v79_v6  ;;  %v82_v11 = vld [vmem:[#allocation5 + $0x38] sm:$0xff]  ;;  %583 = vmatprep.mubr.f32.mxu0 %v59_v9  ;;  %v83_v13 = vld [vmem:[#allocation5 + $0x40] sm:$0xff]  ;;  %v84_v14 = vld [vmem:[#allocation5 + $0x48] sm:$0xff] }
  0x3a   :  { %666 = vmatpush3.bf16.msra.mxu0 %v663_v3  ;;  %v675_v12 = vpack.c.bf16 %v82_v11, %v81_v10  ;;  %v679_v15 = vpack.c.bf16 %v84_v14, %v83_v13  ;;  %v85_v16 = vld [vmem:[#allocation5 + $0x50] sm:$0xff]  ;;  %v86_v17 = vld [vmem:[#allocation5 + $0x58] sm:$0xff]  ;;  %v87_v19 = vld [vmem:[#allocation5 + $0x60] sm:$0xff] }
  0x3b   :  { %668 = vmatprep.subr.bf16.mxu0 %v667_v5  ;;  %v683_v18 = vpack.c.bf16 %v86_v17, %v85_v16  ;;  %v88_v20 = vld [vmem:[#allocation5 + $0x68] sm:$0xff]  ;;  %v89_v22 = vld [vmem:[#allocation5 + $0x70] sm:$0xff]  ;;  %v90_v23 = vld [vmem:[#allocation5 + $0x78] sm:$0xff] }
  0x3c   :  { %v687_v21 = vpack.c.bf16 %v88_v20, %v87_v19  ;;  %v691_v24 = vpack.c.bf16 %v90_v23, %v89_v22  ;;  %v60_v25 = vld [vmem:[#allocation2 + $0x8] sm:$0xff]  ;;  %v61_v26 = vld [vmem:[#allocation2 + $0x10] sm:$0xff]  ;;  %v62_v27 = vld [vmem:[#allocation2 + $0x18] sm:$0xff] }
  0x3d   :  { %v63_v28 = vld [vmem:[#allocation2 + $0x20] sm:$0xff]  ;;  %v64_v29 = vld [vmem:[#allocation2 + $0x28] sm:$0xff]  ;;  %v65_v30 = vld [vmem:[#allocation2 + $0x30] sm:$0xff] }
  0x3e   :  { %670 = vmatpush3.bf16.msra.mxu0 %v667_v5  ;;  %v66_v31 = vld [vmem:[#allocation2 + $0x38] sm:$0xff]  ;;  %v67_v32 = vld [vmem:[#allocation2 + $0x40] sm:$0xff]  ;;  %v68_v33 = vld [vmem:[#allocation2 + $0x48] sm:$0xff] }
  0x3f   :  { %672 = vmatprep.subr.bf16.mxu0 %v671_v8  ;;  %v69_v34 = vld [vmem:[#allocation2 + $0x50] sm:$0xff]  ;;  %v70_v35 = vld [vmem:[#allocation2 + $0x58] sm:$0xff]  ;;  %v71_v36 = vld [vmem:[#allocation2 + $0x60] sm:$0xff] }
  0x40   :  { %v72_v37 = vld [vmem:[#allocation2 + $0x68] sm:$0xff]  ;;  %v73_v38 = vld [vmem:[#allocation2 + $0x70] sm:$0xff]  ;;  %v74_v39 = vld [vmem:[#allocation2 + $0x78] sm:$0xff] }
  0x41   :  { %v236_v40 = vld [vmem:[#allocation7] sm:$0xff]  ;;  %v237_v1 = vld [vmem:[#allocation7 + $0x8] sm:$0xff]  ;;  %v238_v2 = vld [vmem:[#allocation7 + $0x10] sm:$0xff] }
  0x42   :  { %674 = vmatpush3.bf16.msra.mxu0 %v671_v8  ;;  %639 = vmatprep.mubr.f32.mxu1 %v236_v40  ;;  %v239_v3 = vld [vmem:[#allocation7 + $0x18] sm:$0xff]  ;;  %v240_v4 = vld [vmem:[#allocation7 + $0x20] sm:$0xff]  ;;  %v241_v5 = vld [vmem:[#allocation7 + $0x28] sm:$0xff] }
  0x43   :  { %676 = vmatprep.subr.bf16.mxu0 %v675_v12  ;;  %v242_v6 = vld [vmem:[#allocation7 + $0x30] sm:$0xff]  ;;  %v243_v7 = vld [vmem:[#allocation7 + $0x38] sm:$0xff]  ;;  %v244_v8 = vld [vmem:[#allocation7 + $0x40] sm:$0xff] }
  0x44   :  { %v245_v9 = vld [vmem:[#allocation7 + $0x48] sm:$0xff]  ;;  %v246_v10 = vld [vmem:[#allocation7 + $0x50] sm:$0xff]  ;;  %v247_v11 = vld [vmem:[#allocation7 + $0x58] sm:$0xff] }
  0x45   :  { %v249_v13 = vld [vmem:[#allocation7 + $0x68] sm:$0xff]  ;;  %v250_v14 = vld [vmem:[#allocation7 + $0x70] sm:$0xff]  ;;  %v913_v16 = vld [vmem:[%s949_s3] ss:$0 sm:$0xff]  ;;  %s832_s3 = smov [#allocation8]  }
  0x46   :  { %678 = vmatpush3.bf16.msra.mxu0 %v675_v12  ;;  %v248_v12 = vld [vmem:[#allocation7 + $0x60] sm:$0xff]  ;;  %s473_s26 = sshll.u32 %s832_s3, 4  ;;  %s474_s26 = int_to_ptr.vmem [resolvable:$true] %s473_s26 }
  0x47   :  { %680 = vmatprep.subr.bf16.mxu0 %v679_v15  ;;  %s799_s29 = scalar_lea.vmem %s474_s26, 2048  ;;  %p804_p11 = scmp.lt.s32.totalorder %s474_s26, %s474_s26 }
  0x48   :  { %p800_p10 = scmp.ne.s32.totalorder %s474_s26, %s799_s29  ;;  %p805_p12 = scmp.lt.s32.totalorder %s799_s29, %s799_s29 }
  0x4a   :  { %682 = vmatpush3.bf16.msra.mxu0 %v679_v15  ;;  %v251_v15 = vld [vmem:[#allocation7 + $0x78] sm:$0xff]  ;;  %p806_p13 = por %p805_p12, %p804_p11 }
  0x4b   :  { %684 = vmatprep.subr.bf16.mxu0 %v683_v18 }
  0x4c   :  { %p807_p0 = pnand %p806_p13, %p800_p10 }
  0x4e   :  { %686 = vmatpush3.bf16.msra.mxu0 %v683_v18 }
  0x4f   :  { %688 = vmatprep.subr.bf16.mxu0 %v687_v21 }
  0x52   :  { %690 = vmatpush3.bf16.msra.mxu0 %v687_v21 }
  0x53   :  { %692 = vmatprep.subr.bf16.mxu0 %v691_v24 }
  0x56   :  { %694 = vmatpush3.bf16.msra.mxu0 %v691_v24 }
  0x59   :  { %584 = vmatmul.mubr.f32.vlgmr.msra.gmra.mrb[0].mxu0 %v60_v25 }
  0x5a   :  { %586 = vmatprep.mubr.f32.mxu0 %v61_v26 }
  0x5d   :  { %587 = vmatmul.mubr.f32.gmra.mrb[2].mxu0 %v62_v27 }
  0x5e   :  { %589 = vmatprep.mubr.f32.mxu0 %v63_v28 }
  0x61   :  { %590 = vmatmul.mubr.f32.gmra.mrb[4].mxu0 %v64_v29 }
  0x62   :  { %592 = vmatprep.mubr.f32.mxu0 %v65_v30 }
  0x65   :  { %593 = vmatmul.mubr.f32.gmra.mrb[6].mxu0 %v66_v31 }
  0x66   :  { %595 = vmatprep.mubr.f32.mxu0 %v67_v32 }
  0x69   :  { %596 = vmatmul.mubr.f32.gmra.mrb[8].mxu0 %v68_v33 }
  0x6a   :  { %598 = vmatprep.mubr.f32.mxu0 %v69_v34 }
  0x6d   :  { %599 = vmatmul.mubr.f32.gmra.mrb[10].mxu0 %v70_v35 }
  0x6e   :  { %601 = vmatprep.mubr.f32.mxu0 %v71_v36 }
  0x71   :  { %602 = vmatmul.mubr.f32.gmra.mrb[12].mxu0 %v72_v37 }
  0x72   :  { %604 = vmatprep.mubr.f32.mxu0 %v73_v38 }
  0x75   :  { %605 = vmatmul.mubr.f32.gmra.mrb[14].mxu0 %v74_v39 }
 0x12c   :  { %v585_v41 = vpop.f32.mrb[0].mxu0 }
 0x12d   :  { %v157_v42 = vpop.f32.mrb[1].mxu0 }
 0x12e   :  { %v695_v43 = vpack.c.bf16 %v585_v41, %v157_v42 }
 0x130   :  { %v588_v44 = vpop.f32.mrb[2].mxu0  ;;  %696 = vmatprep.subr.bf16.mxu1 %v695_v43 }
 0x131   :  { %v167_v45 = vpop.f32.mrb[3].mxu0  ;;  %698 = vmatpush3.bf16.msra.mxu1 %v695_v43 }
 0x132   :  { %v699_v46 = vpack.c.bf16 %v588_v44, %v167_v45 }
 0x134   :  { %v591_v47 = vpop.f32.mrb[4].mxu0  ;;  %700 = vmatprep.subr.bf16.mxu1 %v699_v46 }
 0x135   :  { %v177_v48 = vpop.f32.mrb[5].mxu0  ;;  %702 = vmatpush3.bf16.msra.mxu1 %v699_v46 }
 0x136   :  { %v703_v49 = vpack.c.bf16 %v591_v47, %v177_v48 }
 0x138   :  { %v594_v50 = vpop.f32.mrb[6].mxu0  ;;  %704 = vmatprep.subr.bf16.mxu1 %v703_v49 }
 0x139   :  { %v187_v51 = vpop.f32.mrb[7].mxu0  ;;  %706 = vmatpush3.bf16.msra.mxu1 %v703_v49 }
 0x13a   :  { %v707_v52 = vpack.c.bf16 %v594_v50, %v187_v51 }
 0x13c   :  { %v597_v53 = vpop.f32.mrb[8].mxu0  ;;  %708 = vmatprep.subr.bf16.mxu1 %v707_v52 }
 0x13d   :  { %v197_v54 = vpop.f32.mrb[9].mxu0  ;;  %710 = vmatpush3.bf16.msra.mxu1 %v707_v52 }
 0x13e   :  { %v711_v55 = vpack.c.bf16 %v597_v53, %v197_v54 }
 0x140   :  { %v600_v56 = vpop.f32.mrb[10].mxu0  ;;  %712 = vmatprep.subr.bf16.mxu1 %v711_v55 }
 0x141   :  { %v207_v57 = vpop.f32.mrb[11].mxu0  ;;  %714 = vmatpush3.bf16.msra.mxu1 %v711_v55 }
 0x142   :  { %v715_v58 = vpack.c.bf16 %v600_v56, %v207_v57 }
 0x144   :  { %v603_v59 = vpop.f32.mrb[12].mxu0  ;;  %716 = vmatprep.subr.bf16.mxu1 %v715_v58 }
 0x145   :  { %v217_v60 = vpop.f32.mrb[13].mxu0  ;;  %718 = vmatpush3.bf16.msra.mxu1 %v715_v58 }
 0x146   :  { %v719_v61 = vpack.c.bf16 %v603_v59, %v217_v60 }
 0x148   :  { %v606_v62 = vpop.f32.mrb[14].mxu0  ;;  %720 = vmatprep.subr.bf16.mxu1 %v719_v61 }
 0x149   :  { %v227_v63 = vpop.f32.mrb[15].mxu0  ;;  %722 = vmatpush3.bf16.msra.mxu1 %v719_v61 }
 0x14a   :  { %v723_v0 = vpack.c.bf16 %v606_v62, %v227_v63 }
 0x14c   :  { %724 = vmatprep.subr.bf16.mxu1 %v723_v0 }
 0x14d   :  { %726 = vmatpush3.bf16.msra.mxu1 %v723_v0 }
 0x150   :  { %640 = vmatmul.mubr.f32.vlgmr.msra.gmra.mrb[0].mxu1 %v237_v1 }
 0x151   :  { %642 = vmatprep.mubr.f32.mxu1 %v238_v2 }
 0x154   :  { %643 = vmatmul.mubr.f32.gmra.mrb[2].mxu1 %v239_v3 }
 0x155   :  { %645 = vmatprep.mubr.f32.mxu1 %v240_v4 }
 0x158   :  { %646 = vmatmul.mubr.f32.gmra.mrb[4].mxu1 %v241_v5 }
 0x159   :  { %648 = vmatprep.mubr.f32.mxu1 %v242_v6 }
 0x15c   :  { %649 = vmatmul.mubr.f32.gmra.mrb[6].mxu1 %v243_v7 }
 0x15d   :  { %651 = vmatprep.mubr.f32.mxu1 %v244_v8 }
 0x160   :  { %652 = vmatmul.mubr.f32.gmra.mrb[8].mxu1 %v245_v9 }
 0x161   :  { %654 = vmatprep.mubr.f32.mxu1 %v246_v10 }
 0x164   :  { %655 = vmatmul.mubr.f32.gmra.mrb[10].mxu1 %v247_v11 }
 0x165   :  { %657 = vmatprep.mubr.f32.mxu1 %v248_v12 }
 0x168   :  { %658 = vmatmul.mubr.f32.gmra.mrb[12].mxu1 %v249_v13 }
 0x169   :  { %660 = vmatprep.mubr.f32.mxu1 %v250_v14 }
 0x16c   :  { %661 = vmatmul.mubr.f32.gmra.mrb[14].mxu1 %v251_v15 }
 0x223   :  { %v641_v17 = vpop.f32.mrb[0].mxu1 }
 0x224   :  { %v331_v18 = vadd.f32 %v641_v17, %v913_v16  ;;  %v325_v19 = vpop.f32.mrb[1].mxu1 }
 0x225   :  { %v326_v20 = vadd.f32 %v913_v16, %v325_v19 }
 0x226   :  { %vm405_vm0 = vcmp.gt.f32.partialorder %v331_v18, 0.0  ;;  %v421_v21 = vmul.f32 0.2, %v331_v18 }
 0x227   :  { %vm404_vm1 = vcmp.gt.f32.partialorder %v326_v20, 0.0  ;;  %v420_v22 = vmul.f32 0.2, %v326_v20  ;;  %v644_v23 = vpop.f32.mrb[2].mxu1 }
 0x228   :  { %v437_v24 = vsel %vm405_vm0, %v331_v18, %v421_v21  ;;  %v341_v25 = vadd.f32 %v644_v23, %v913_v16  ;;  %v335_v26 = vpop.f32.mrb[3].mxu1 }
 0x229   :  { %453 = vst [vmem:[#allocation8 + $0x8] sm:$0xff] %v437_v24  ;;  %v436_v27 = vsel %vm404_vm1, %v326_v20, %v420_v22  ;;  %v336_v28 = vadd.f32 %v913_v16, %v335_v26 }
 0x22a   :  { %452 = vst [vmem:[#allocation8] sm:$0xff] %v436_v27  ;;  %vm407_vm2 = vcmp.gt.f32.partialorder %v341_v25, 0.0  ;;  %v423_v29 = vmul.f32 0.2, %v341_v25 }
 0x22b   :  { %vm406_vm3 = vcmp.gt.f32.partialorder %v336_v28, 0.0  ;;  %v422_v30 = vmul.f32 0.2, %v336_v28  ;;  %v647_v31 = vpop.f32.mrb[4].mxu1 }
 0x22c   :  { %v439_v32 = vsel %vm407_vm2, %v341_v25, %v423_v29  ;;  %v351_v33 = vadd.f32 %v647_v31, %v913_v16  ;;  %v345_v34 = vpop.f32.mrb[5].mxu1 }
 0x22d   :  { %455 = vst [vmem:[#allocation8 + $0x18] sm:$0xff] %v439_v32  ;;  %v438_v35 = vsel %vm406_vm3, %v336_v28, %v422_v30  ;;  %v346_v36 = vadd.f32 %v913_v16, %v345_v34 }
 0x22e   :  { %454 = vst [vmem:[#allocation8 + $0x10] sm:$0xff] %v438_v35  ;;  %vm409_vm4 = vcmp.gt.f32.partialorder %v351_v33, 0.0  ;;  %v425_v37 = vmul.f32 0.2, %v351_v33 }
 0x22f   :  { %vm408_vm5 = vcmp.gt.f32.partialorder %v346_v36, 0.0  ;;  %v424_v38 = vmul.f32 0.2, %v346_v36  ;;  %v650_v39 = vpop.f32.mrb[6].mxu1 }
 0x230   :  { %v441_v40 = vsel %vm409_vm4, %v351_v33, %v425_v37  ;;  %v361_v41 = vadd.f32 %v650_v39, %v913_v16  ;;  %v355_v42 = vpop.f32.mrb[7].mxu1 }
 0x231   :  { %457 = vst [vmem:[#allocation8 + $0x28] sm:$0xff] %v441_v40  ;;  %v440_v43 = vsel %vm408_vm5, %v346_v36, %v424_v38  ;;  %v356_v44 = vadd.f32 %v913_v16, %v355_v42 }
 0x232   :  { %456 = vst [vmem:[#allocation8 + $0x20] sm:$0xff] %v440_v43  ;;  %vm411_vm6 = vcmp.gt.f32.partialorder %v361_v41, 0.0  ;;  %v427_v45 = vmul.f32 0.2, %v361_v41 }
 0x233   :  { %vm410_vm7 = vcmp.gt.f32.partialorder %v356_v44, 0.0  ;;  %v426_v46 = vmul.f32 0.2, %v356_v44  ;;  %v653_v47 = vpop.f32.mrb[8].mxu1 }
 0x234   :  { %v443_v48 = vsel %vm411_vm6, %v361_v41, %v427_v45  ;;  %v371_v49 = vadd.f32 %v653_v47, %v913_v16  ;;  %v365_v50 = vpop.f32.mrb[9].mxu1 }
 0x235   :  { %459 = vst [vmem:[#allocation8 + $0x38] sm:$0xff] %v443_v48  ;;  %v442_v51 = vsel %vm410_vm7, %v356_v44, %v426_v46  ;;  %v366_v52 = vadd.f32 %v913_v16, %v365_v50 }
 0x236   :  { %458 = vst [vmem:[#allocation8 + $0x30] sm:$0xff] %v442_v51  ;;  %vm413_vm8 = vcmp.gt.f32.partialorder %v371_v49, 0.0  ;;  %v429_v53 = vmul.f32 0.2, %v371_v49 }
 0x237   :  { %vm412_vm9 = vcmp.gt.f32.partialorder %v366_v52, 0.0  ;;  %v428_v54 = vmul.f32 0.2, %v366_v52  ;;  %v656_v55 = vpop.f32.mrb[10].mxu1 }
 0x238   :  { %v445_v56 = vsel %vm413_vm8, %v371_v49, %v429_v53  ;;  %v381_v57 = vadd.f32 %v656_v55, %v913_v16  ;;  %v375_v58 = vpop.f32.mrb[11].mxu1 }
 0x239   :  { %461 = vst [vmem:[#allocation8 + $0x48] sm:$0xff] %v445_v56  ;;  %v444_v59 = vsel %vm412_vm9, %v366_v52, %v428_v54  ;;  %v376_v60 = vadd.f32 %v913_v16, %v375_v58 }
 0x23a   :  { %460 = vst [vmem:[#allocation8 + $0x40] sm:$0xff] %v444_v59  ;;  %vm415_vm10 = vcmp.gt.f32.partialorder %v381_v57, 0.0  ;;  %v431_v61 = vmul.f32 0.2, %v381_v57 }
 0x23b   :  { %vm414_vm11 = vcmp.gt.f32.partialorder %v376_v60, 0.0  ;;  %v430_v62 = vmul.f32 0.2, %v376_v60  ;;  %v659_v63 = vpop.f32.mrb[12].mxu1 }
 0x23c   :  { %v447_v0 = vsel %vm415_vm10, %v381_v57, %v431_v61  ;;  %v391_v1 = vadd.f32 %v659_v63, %v913_v16  ;;  %v385_v2 = vpop.f32.mrb[13].mxu1 }
 0x23d   :  { %463 = vst [vmem:[#allocation8 + $0x58] sm:$0xff] %v447_v0  ;;  %v446_v3 = vsel %vm414_vm11, %v376_v60, %v430_v62  ;;  %v386_v4 = vadd.f32 %v913_v16, %v385_v2 }
 0x23e   :  { %462 = vst [vmem:[#allocation8 + $0x50] sm:$0xff] %v446_v3  ;;  %vm417_vm12 = vcmp.gt.f32.partialorder %v391_v1, 0.0  ;;  %v433_v5 = vmul.f32 0.2, %v391_v1 }
 0x23f   :  { %vm416_vm13 = vcmp.gt.f32.partialorder %v386_v4, 0.0  ;;  %v432_v6 = vmul.f32 0.2, %v386_v4  ;;  %v662_v7 = vpop.f32.mrb[14].mxu1 }
 0x240   :  { %v449_v8 = vsel %vm417_vm12, %v391_v1, %v433_v5  ;;  %v401_v9 = vadd.f32 %v662_v7, %v913_v16  ;;  %v395_v10 = vpop.f32.mrb[15].mxu1 }
 0x241   :  { %465 = vst [vmem:[#allocation8 + $0x68] sm:$0xff] %v449_v8  ;;  %v448_v11 = vsel %vm416_vm13, %v386_v4, %v432_v6  ;;  %v396_v12 = vadd.f32 %v913_v16, %v395_v10 }
 0x242   :  { %464 = vst [vmem:[#allocation8 + $0x60] sm:$0xff] %v448_v11  ;;  %vm419_vm14 = vcmp.gt.f32.partialorder %v401_v9, 0.0  ;;  %v435_v13 = vmul.f32 0.2, %v401_v9 }
 0x243   :  { %vm418_vm15 = vcmp.gt.f32.partialorder %v396_v12, 0.0  ;;  %v434_v14 = vmul.f32 0.2, %v396_v12 }
 0x244   :  { %v451_v15 = vsel %vm419_vm14, %v401_v9, %v435_v13 }
 0x245   :  { %467 = vst [vmem:[#allocation8 + $0x78] sm:$0xff] %v451_v15  ;;  %v450_v17 = vsel %vm418_vm15, %v396_v12, %v434_v14 }
 0x246   :  { %466 = vst [vmem:[#allocation8 + $0x70] sm:$0xff] %v450_v17 }
 0x247   :  { %810 = shalt.err (!%p807_p0)
}
 0x248   :  { %s811_s6 = scalar_lea.hbm %s950_s4, 2048 }
 0x249   :  { %p812_p1 = scmp.ne.s32.totalorder %s950_s4, %s811_s6  ;;  %p815_p2 = scmp.lt.u32.totalorder %s811_s6, %s950_s4 }
 0x24b   :  { %p817_p3 = pnand %p815_p2, %p812_p1 }
 0x24d   :  { %820 = shalt.err (!%p817_p3)
}
 0x24e   :  { %479 = dma.vmem_to_hbm [thread:$0]  %s474_s26, 2048, %s950_s4, [#allocation4], %s829_s27, %s829_s27, %s830_s28  }
 0x24f   :  { %825 = dma.done.wait [#allocation4], 2048  }
 0x250   :  { %826 = vsyncadd [#allocation4], 4294965248 }
 0x251   :  { %483 = vsyncpa [#allocation3], 1 }
 0x252   :  { %484 = vsyncpa [#allocation6], 1 }
 0x253   :  { %485 = vsyncpa [#allocation4], 1 }

</bundles_post_ra>
